<compile_context>
chip_gen: v6e
topology: v6e:2x2x1
jax: 0.10.0
libtpu: 0.0.40
codegen_flags: <defaults>
</compile_context>

<pallas_src>
import jax
import jax.numpy as jnp
from jax.experimental import pallas as pl
from jax.experimental.pallas import tpu as pltpu


# ---------------------------------------------------------------------------
# Fused kernel: proto head (matmul + bias + ReLU) + mask assembly + BCE partials
# ---------------------------------------------------------------------------
def _fused_proto_loss_kernel(xk_ref, wT_ref, b_ref, coeff_ref, mask_ref, out_ref):
    # xk_ref:    [1, K, tile_hw]  bf16   im2col'd patches, HW on lanes (K = 9*Cin)
    # wT_ref:    [P, K]           bf16   conv weights, transposed (resident)
    # b_ref:     [P, 1]           f32    conv bias (resident)
    # coeff_ref: [1, T, P]        bf16   per-instance proto coefficients (resident per n)
    # mask_ref:  [1, T, tile_hw]  bf16   GT instance masks, HW on lanes (streamed)
    # out_ref:   [1, T, tile_hw]  f32    per-batch BCE partial-sum accumulator
    i = pl.program_id(1)

    @pl.when(i == 0)
    def _():
        out_ref[...] = jnp.zeros_like(out_ref)

    # --- proto head: [P, K] @ [K, tile_hw] -> [P, tile_hw]; never leaves VMEM ---
    proto = jnp.dot(wT_ref[...], xk_ref[0], preferred_element_type=jnp.float32)
    proto = jnp.maximum(proto + b_ref[...], 0.0)            # bias + ReLU

    # --- assembled instance-mask logits: [T, P] @ [P, tile_hw] -> [T, tile_hw] ---
    z = jnp.dot(coeff_ref[0], proto.astype(jnp.bfloat16),
                preferred_element_type=jnp.float32)
    gt = mask_ref[0].astype(jnp.float32)

    # stable sigmoid BCE:  max(z,0) - z*m + log(1 + exp(-|z|))   (f32 elementwise)
    bce = jnp.maximum(z, 0.0) - z * gt + jnp.log(1.0 + jnp.exp(-jnp.abs(z)))

    # lane/sublane-parallel accumulation (pure VPU); full reduction happens in JAX
    out_ref[0] += bce


def _pick_tile_hw(hw, max_tile=2048):
    """Largest multiple-of-128 divisor of hw that is <= max_tile (else full hw)."""
    if hw % 128 != 0:
        return hw
    best = 128
    for cand in range(128, min(hw, max_tile) + 1, 128):
        if hw % cand == 0:
            best = cand
    return best


def fused_proto_mask_loss(patchesT, wT, b, coeffs, masks_flat, *, tile_hw=None):
    N, K, HW = patchesT.shape
    P = wT.shape[0]
    T = coeffs.shape[1]
    if tile_hw is None:
        tile_hw = _pick_tile_hw(HW)
    assert HW % tile_hw == 0, "tile_hw must divide H*W"
    n_tiles = HW // tile_hw

    cost = pl.CostEstimate(
        flops=2 * N * HW * K * P + 2 * N * HW * T * P,
        transcendentals=2 * N * T * HW,
        bytes_accessed=(N * K * HW * 2          # patches (bf16)
                        + N * T * HW * 2        # masks   (bf16)
                        + N * T * P * 2         # coeffs  (bf16)
                        + P * K * 2 + P * 4     # weights + bias
                        + N * T * tile_hw * 4), # per-batch partial output (f32)
    )

    return pl.pallas_call(
        _fused_proto_loss_kernel,
        out_shape=jax.ShapeDtypeStruct((N, T, tile_hw), jnp.float32),
        grid=(N, n_tiles),
        in_specs=[
            pl.BlockSpec((1, K, tile_hw), lambda n, i: (n, 0, i)),   # patches (streamed)
            pl.BlockSpec((P, K),          lambda n, i: (0, 0)),      # wT (resident)
            pl.BlockSpec((P, 1),          lambda n, i: (0, 0)),      # bias (resident)
            pl.BlockSpec((1, T, P),       lambda n, i: (n, 0, 0)),   # coeffs (resident per n)
            pl.BlockSpec((1, T, tile_hw), lambda n, i: (n, 0, i)),   # masks (streamed)
        ],
        out_specs=pl.BlockSpec((1, T, tile_hw), lambda n, i: (n, 0, 0)),
        compiler_params=pltpu.CompilerParams(
            dimension_semantics=("parallel", "arbitrary")),
        cost_estimate=cost,
    )(patchesT, wT, b, coeffs, masks_flat)


# ---------------------------------------------------------------------------
# NetLoss.forward equivalent
# ---------------------------------------------------------------------------
def net_loss_forward(params, images, targets, masks, num_crowds, *, tile_hw=None):
    # num_crowds is accepted (like the PyTorch forward) but unused by the criterion.
    # TODO(synk): if the reference criterion excludes crowd instances, mask them here.
    del num_crowds
    N, H, W, C = images.shape
    HW = H * W
    K = 9 * C
    P = params['w'].shape[1]
    T = masks.shape[1]

    # --- 3x3 patch gather, transposed to lane-dense-on-HW bf16 layout [N, K, HW] ---
    xp = jnp.pad(images, ((0, 0), (1, 1), (1, 1), (0, 0)))
    shifts = [xp[:, i:i + H, j:j + W, :] for i in range(3) for j in range(3)]
    patches = jnp.stack(shifts, axis=-2)                       # [N, H, W, 9, C]
    patchesT = (patches.reshape(N, HW, K)
                .transpose(0, 2, 1)
                .astype(jnp.bfloat16))                         # [N, K, HW]

    wT = params['w'].T.astype(jnp.bfloat16)                    # [P, K]
    b = params['b'].reshape(P, 1).astype(jnp.float32)          # [P, 1]
    coeffs = targets.astype(jnp.bfloat16)                      # [N, T, P]
    masks_flat = masks.reshape(N, T, HW).astype(jnp.bfloat16)  # [N, T, HW] (0/1 exact)

    # --- fused net + criterion: per-batch lane-parallel BCE partial sums ---
    partials = fused_proto_mask_loss(patchesT, wT, b, coeffs, masks_flat,
                                     tile_hw=tile_hw)          # [N, T, tile_hw] f32

    loss = jnp.sum(partials) / float(N * T * HW)               # mean over N*T*H*W

    losses = {'mask': loss}
    losses['rgb'] = images
    return losses


if __name__ == "__main__":
    key = jax.random.PRNGKey(0)
    k1, k2, k3, k4 = jax.random.split(key, 4)

    # small shapes: batch=2, 16x16 RGB images, 32 proto channels, 3 instances
    N, H, W, C, P, T = 2, 16, 16, 3, 32, 3

    images = jax.random.uniform(k1, (N, H, W, C), jnp.float32)
    targets = jax.random.normal(k2, (N, T, P), jnp.float32)          # proto coeffs
    masks = (jax.random.uniform(k3, (N, T, H, W)) > 0.5).astype(jnp.float32)
    num_crowds = jnp.zeros((N,), jnp.int32)

    # deterministic parameter init (3x3 conv: 9*C -> P)
    params = {
        'w': 0.1 * jax.random.normal(k4, (9 * C, P), jnp.float32),
        'b': jnp.zeros((P,), jnp.float32),
    }

    # tile_hw=128 -> grid (N=2, HW tiles=2): exercises both the parallel batch
    # axis and the in-kernel accumulation across HW tiles.
    losses = net_loss_forward(params, images, targets, masks, num_crowds, tile_hw=128)
    jax.block_until_ready(losses['mask'])
    jax.block_until_ready(losses['rgb'])
    print("KERNEL_OK")
</pallas_src>

<mosaic_0001>
module attributes {stable_mosaic.version = 11 : i64} {
  func.func @_fused_proto_loss_kernel(%arg0: i32, %arg1: i32, %arg2: memref<1x27x128xbf16, #tpu.memory_space<vmem>>, %arg3: memref<32x27xbf16, #tpu.memory_space<vmem>>, %arg4: memref<32x1xf32, #tpu.memory_space<vmem>>, %arg5: memref<1x3x32xbf16, #tpu.memory_space<vmem>>, %arg6: memref<1x3x128xbf16, #tpu.memory_space<vmem>>, %arg7: memref<1x3x128xf32, #tpu.memory_space<vmem>>) attributes {dimension_semantics = [#tpu.dimension_semantics<parallel>, #tpu.dimension_semantics<arbitrary>], iteration_bounds = array<i64: 2, 2>, scalar_prefetch = 0 : i64, scratch_operands = 0 : i64, tpu.core_type = #tpu.core_type<tc>, window_params = [{transform_indices = @transform_0, window_bounds = array<i64: 1, 27, 128>}, {pipeline_mode = #tpu.pipeline_mode<synchronous>, transform_indices = @transform_1, window_bounds = array<i64: 32, 27>}, {pipeline_mode = #tpu.pipeline_mode<synchronous>, transform_indices = @transform_2, window_bounds = array<i64: 32, 1>}, {transform_indices = @transform_3, window_bounds = array<i64: 1, 3, 32>}, {transform_indices = @transform_4, window_bounds = array<i64: 1, 3, 128>}, {transform_indices = @transform_5, window_bounds = array<i64: 1, 3, 128>}]} {
    %c0_i32 = arith.constant 0 : i32
    %0 = arith.cmpi eq, %arg1, %c0_i32 : i32
    %1 = arith.extui %0 : i1 to i32
    %c0_i32_0 = arith.constant 0 : i32
    %2 = arith.cmpi ne, %1, %c0_i32_0 : i32
    scf.if %2 {
      %cst_24 = arith.constant 0.000000e+00 : f32
      %37 = vector.broadcast %cst_24 : f32 to vector<1x3x128xf32>
      %c0_25 = arith.constant 0 : index
      %c0_26 = arith.constant 0 : index
      %c0_27 = arith.constant 0 : index
      %38 = vector.load %arg7[%c0_25, %c0_26, %c0_27] : memref<1x3x128xf32, #tpu.memory_space<vmem>>, vector<1x3x128xf32>
      tpu.vector_store %arg7[%c0_25, %c0_26, %c0_27], %37 {strides = array<i32>} : memref<1x3x128xf32, #tpu.memory_space<vmem>>, vector<1x3x128xf32>,
    } else {
    }
    %c0 = arith.constant 0 : index
    %c0_1 = arith.constant 0 : index
    %3 = vector.load %arg3[%c0, %c0_1] : memref<32x27xbf16, #tpu.memory_space<vmem>>, vector<32x27xbf16>
    %c0_2 = arith.constant 0 : index
    %c0_3 = arith.constant 0 : index
    %c0_4 = arith.constant 0 : index
    %4 = vector.load %arg2[%c0_2, %c0_3, %c0_4] : memref<1x27x128xbf16, #tpu.memory_space<vmem>>, vector<1x27x128xbf16>
    %5 = vector.shape_cast %4 : vector<1x27x128xbf16> to vector<27x128xbf16>
    %cst = arith.constant dense<0.000000e+00> : vector<32x128xf32>
    %6 = tpu.matmul %3, %5, %cst {dimension_numbers = #tpu.dot_dimension_numbers<[1], [0], [0], [1], [0, 0, 1, 1], [], []>} : vector<32x27xbf16>, vector<27x128xbf16>, vector<32x128xf32> -> vector<32x128xf32>
    %c0_5 = arith.constant 0 : index
    %c0_6 = arith.constant 0 : index
    %7 = vector.load %arg4[%c0_5, %c0_6] : memref<32x1xf32, #tpu.memory_space<vmem>>, vector<32x1xf32>
    %8 = vector.broadcast %7 : vector<32x1xf32> to vector<32x128xf32>
    %9 = arith.addf %6, %8 : vector<32x128xf32>
    %cst_7 = arith.constant 0.000000e+00 : f32
    %10 = vector.broadcast %cst_7 : f32 to vector<32x128xf32>
    %11 = arith.maximumf %9, %10 : vector<32x128xf32>
    %c0_8 = arith.constant 0 : index
    %c0_9 = arith.constant 0 : index
    %c0_10 = arith.constant 0 : index
    %12 = vector.load %arg5[%c0_8, %c0_9, %c0_10] : memref<1x3x32xbf16, #tpu.memory_space<vmem>>, vector<1x3x32xbf16>
    %13 = vector.shape_cast %12 : vector<1x3x32xbf16> to vector<3x32xbf16>
    %14 = arith.truncf %11 : vector<32x128xf32> to vector<32x128xbf16>
    %cst_11 = arith.constant dense<0.000000e+00> : vector<3x128xf32>
    %15 = tpu.matmul %13, %14, %cst_11 {dimension_numbers = #tpu.dot_dimension_numbers<[1], [0], [0], [1], [0, 0, 1, 1], [], []>} : vector<3x32xbf16>, vector<32x128xbf16>, vector<3x128xf32> -> vector<3x128xf32>
    %c0_12 = arith.constant 0 : index
    %c0_13 = arith.constant 0 : index
    %c0_14 = arith.constant 0 : index
    %16 = vector.load %arg6[%c0_12, %c0_13, %c0_14] : memref<1x3x128xbf16, #tpu.memory_space<vmem>>, vector<1x3x128xbf16>
    %17 = vector.shape_cast %16 : vector<1x3x128xbf16> to vector<3x128xbf16>
    %18 = arith.extf %17 : vector<3x128xbf16> to vector<3x128xf32>
    %cst_15 = arith.constant 0.000000e+00 : f32
    %19 = vector.broadcast %cst_15 : f32 to vector<3x128xf32>
    %20 = arith.maximumf %15, %19 : vector<3x128xf32>
    %21 = arith.mulf %15, %18 : vector<3x128xf32>
    %22 = arith.subf %20, %21 : vector<3x128xf32>
    %23 = math.absf %15 : vector<3x128xf32>
    %cst_16 = arith.constant 0.000000e+00 : f32
    %24 = vector.broadcast %cst_16 : f32 to vector<3x128xf32>
    %25 = arith.subf %24, %23 : vector<3x128xf32>
    %26 = math.exp %25 : vector<3x128xf32>
    %cst_17 = arith.constant 1.000000e+00 : f32
    %27 = vector.broadcast %cst_17 : f32 to vector<3x128xf32>
    %28 = arith.addf %27, %26 : vector<3x128xf32>
    %29 = math.log %28 : vector<3x128xf32>
    %30 = arith.addf %22, %29 : vector<3x128xf32>
    %c0_18 = arith.constant 0 : index
    %c0_19 = arith.constant 0 : index
    %c0_20 = arith.constant 0 : index
    %31 = vector.load %arg7[%c0_18, %c0_19, %c0_20] : memref<1x3x128xf32, #tpu.memory_space<vmem>>, vector<1x3x128xf32>
    %32 = vector.shape_cast %31 : vector<1x3x128xf32> to vector<3x128xf32>
    %33 = arith.addf %32, %30 : vector<3x128xf32>
    %c0_21 = arith.constant 0 : index
    %c0_22 = arith.constant 0 : index
    %c0_23 = arith.constant 0 : index
    %34 = vector.load %arg7[%c0_21, %c0_22, %c0_23] : memref<1x3x128xf32, #tpu.memory_space<vmem>>, vector<1x3x128xf32>
    %35 = vector.shape_cast %34 : vector<1x3x128xf32> to vector<3x128xf32>
    %36 = vector.shape_cast %33 : vector<3x128xf32> to vector<1x3x128xf32>
    tpu.vector_store %arg7[%c0_21, %c0_22, %c0_23], %36 {strides = array<i32>} : memref<1x3x128xf32, #tpu.memory_space<vmem>>, vector<1x3x128xf32>,
    return
  }
  func.func @transform_0(%arg0: i32, %arg1: i32) -> (i32, i32, i32) {
    %c0_i32 = arith.constant 0 : i32
    %c0_i32_0 = arith.constant 0 : i32
    return %arg0, %c0_i32, %arg1 : i32, i32, i32
  }
  func.func @transform_1(%arg0: i32, %arg1: i32) -> (i32, i32) {
    %c0_i32 = arith.constant 0 : i32
    %c0_i32_0 = arith.constant 0 : i32
    %c0_i32_1 = arith.constant 0 : i32
    return %c0_i32, %c0_i32_0 : i32, i32
  }
  func.func @transform_2(%arg0: i32, %arg1: i32) -> (i32, i32) {
    %c0_i32 = arith.constant 0 : i32
    %c0_i32_0 = arith.constant 0 : i32
    %c0_i32_1 = arith.constant 0 : i32
    return %c0_i32, %c0_i32_0 : i32, i32
  }
  func.func @transform_3(%arg0: i32, %arg1: i32) -> (i32, i32, i32) {
    %c0_i32 = arith.constant 0 : i32
    %c0_i32_0 = arith.constant 0 : i32
    %c0_i32_1 = arith.constant 0 : i32
    return %arg0, %c0_i32, %c0_i32_0 : i32, i32, i32
  }
  func.func @transform_4(%arg0: i32, %arg1: i32) -> (i32, i32, i32) {
    %c0_i32 = arith.constant 0 : i32
    %c0_i32_0 = arith.constant 0 : i32
    return %arg0, %c0_i32, %arg1 : i32, i32, i32
  }
  func.func @transform_5(%arg0: i32, %arg1: i32) -> (i32, i32, i32) {
    %c0_i32 = arith.constant 0 : i32
    %c0_i32_0 = arith.constant 0 : i32
    %c0_i32_1 = arith.constant 0 : i32
    return %arg0, %c0_i32, %c0_i32_0 : i32, i32, i32
  }
}

</mosaic_0001>

<bundles_post_ra>
// kernel: tpu_custom_call.1
= control target key start
LH: loop header
LB: loop body
LE: loop exit
PB: predicated region body
PF: predicated region fallthrough
CT: control target
= control target key end

     0   :  { %s841_s18 = smov 0   ;;  %s843_s19 = smov 0   ;;  %s970_s0 = inlined_call_operand.vmem [shape: bf16[2,27,256], index: 0, kind: input, shape index: {}]   ;;  %s971_s1 = inlined_call_operand.vmem [shape: bf16[32,27], index: 1, kind: input, shape index: {}]   ;;  %s972_s2 = inlined_call_operand.vmem [shape: f32[32,1], index: 2, kind: input, shape index: {}]   ;;  %s973_s3 = inlined_call_operand.vmem [shape: bf16[2,3,32], index: 3, kind: input, shape index: {}]   ;;  %s974_s4 = inlined_call_operand.vmem [shape: bf16[2,3,256], index: 4, kind: input, shape index: {}]   ;;  %s975_s5 = inlined_call_operand.vmem [shape: f32[2,3,128], index: 5, kind: output, shape index: {}]  }
   0x1   :  { %s845_s20 = smov 0   ;;  %s847_s21 = smov 0  }
   0x2   :  { %s849_s22 = smov 0   ;;  %s851_s23 = smov 0  }
   0x3   :  { %s853_s24 = smov 0  }
   0x4 LB: > { %s24_s25 = sadd.s32 1, %s796_s22  ;;  %s27_s26 = sadd.s32 1, %s800_s23  ;;  %s804_s24 = sphi %s853_s24, %s15_s24   ;;  %s800_s23 = sphi %s851_s23, %s981_s23   ;;  %s796_s22 = sphi %s849_s22, %s980_s22   ;;  %s792_s21 = sphi %s847_s21, %s979_s21   ;;  %s788_s20 = sphi %s845_s20, %s978_s20   ;;  %s784_s19 = sphi %s843_s19, %s977_s19   ;;  %s780_s18 = sphi %s841_s18, %s976_s18  }
   0x5   : > { %p25_p0 = scmp.ge.s32.totalorder %s24_s25, 2  ;;  %p43_p1 = scmp.ne.s32.totalorder %s784_s19, %s780_s18 }
   0x6   : > { %p44_p2 = scmp.eq.s32.totalorder %s804_s24, 0  ;;  %s36_s30 = sadd.s32 1, %s784_s19 }
   0x7   : > { %s983_s25 = smov (%p25_p0, %s24_s25), 0  ;;  %s985_s26 = smov (!%p25_p0, %s27_s26), %s800_s23 }
   0x8   : > { %p45_p3 = por %p44_p2, %p43_p1  ;;  %p29_p4 = scmp.ge.s32.totalorder %s985_s26, 2 }
   0x9   : > { %s32_s27 = ssub.s32 %s796_s22, %s983_s25  ;;  %p636_p6 = scmp.ge.s32.totalorder %s804_s24, 4 }
   0xa   : > { %s987_s26 = smov (%p29_p4, %s985_s26), 0 }
   0xb   : > { %s31_s28 = ssub.s32 %s800_s23, %s987_s26  ;;  %197 = sbr.rel (%p636_p6) target bundleno = 24 (0x18), region = 24 }
   0xc   : > { %s33_s29 = sor.u32 %s32_s27, %s31_s28 }
   0xd   : > { %p34_p5 = scmp.eq.s32.totalorder %s33_s29, 0 }
   0xf   : > { %s892_s6 = scalar_select %p34_p5, %s784_s19, %s36_s30  }
  0x10   : > { %200 = sbr.rel (!%p45_p3) target bundleno = 24 (0x18), region = 28  ;;  %s202_s7 = sand.u32 (%p45_p3), 1, %s784_s19  }
  0x11   : > { %s638_s8 = sshll.u32 (%p45_p3), %s800_s23, 3  ;;  %s637_s9 = sshll.u32 (%p45_p3), %s202_s7, 4 }
  0x12   : > { %s206_s10 = sadd.s32 (%p45_p3), %s796_s22, %s638_s8  ;;  %s204_s15 = scalar_lea.vmem (%p45_p3), [#allocation2], %s637_s9 }
  0x13   : > { %s639_s11 = sshll.u32 (%p45_p3), %s206_s10, 2 }
  0x14   : > { %s208_s14 = scalar_lea.vmem (%p45_p3), %s970_s0, %s639_s11 }
  0x15   : > { %v225_v0 = vld [vmem:[%s208_s14] sm:$0xf]  ;;  %v227_v1 = vld [vmem:[%s208_s14 + $0x8] sm:$0xf]  ;;  %v229_v2 = vld [vmem:[%s208_s14 + $0x10] sm:$0xf] }
  0x16   : > { %226 = vst [vmem:[%s204_s15] sm:$0xf] %v225_v0  ;;  %228 = vst [vmem:[%s204_s15 + $0x4] sm:$0xf] %v227_v1  ;;  %v231_v3 = vld [vmem:[%s208_s14 + $0x18] sm:$0xf] }
  0x17   : > { %230 = vst [vmem:[%s204_s15 + $0x8] sm:$0xf] %v229_v2  ;;  %232 = vst [vmem:[%s204_s15 + $0xc] sm:$0xf] %v231_v3 }
  0x18 PF: > { %p640_p7 = scmp.ge.s32.totalorder %s804_s24, 1  ;;  %p281_p8 = scmp.lt.s32.totalorder %s804_s24, 5 }
  0x1a   : > { %p282_p9 = pnand %p640_p7, %p281_p8 }
  0x1b   : > { %s288_s16 = sand.u32 (!%p282_p9), 1, %s780_s18   ;;  %p326_p10 = scmp.lt.s32.totalorder (!%p282_p9), %s792_s21, 1 }
  0x1c   : > { %285 = sbr.rel (%p282_p9) target bundleno = 504 (0x1f8), region = 77  ;;  %s641_s17 = sshll.u32 (!%p282_p9), %s288_s16, 4 }
  0x1d   : > { %p332_p11 = scmp.lt.s32.totalorder (!%p282_p9), %s788_s20, 1  ;;  %s290_s16 = scalar_lea.vmem (!%p282_p9), [#allocation2], %s641_s17 }
  0x1e   : > { %p646_p12 = scmp.ne.s32.totalorder (!%p282_p9), %s788_s20, 0 }
  0x21   : > { %s989_s21 = smov (!%p326_p10, %s792_s21), 1 }
  0x22   : > { %s333_s27 = scalar_select %p332_p11, %s788_s20, 1 }
  0x23   : > { %s642_s28 = sshll.u32 %s989_s21, 1  ;;  %s645_s29 = sshll.u32 %s989_s21, 2 }
  0x24   : > { %s911_s8 = scalar_lea.vmem %s973_s3, %s642_s28  ;;  %s335_s9 = sadd.s32 %s642_s28, %s333_s27 }
  0x25   : > { %s644_s10 = sshll.u32 %s335_s9, 1  ;;  %s916_s13 = scalar_lea.vmem %s975_s5, %s645_s29 }
  0x26   : > { %s921_s15 = scalar_lea.vmem %s974_s4, %s644_s10  ;;  %346 = sbr.rel (%p646_p12) target bundleno = 45 (0x2d), region = 85 }
  0x2b   : > { %v806_v4 = vmov 0.0  }
  0x2c   : > { %347 = vst [vmem:[%s916_s13] sm:$0x7] %v806_v4 }
  0x2d PF: > { %v742_v5 = vld [vmem:[%s290_s16 + $0x8] sm:$0x3f]   ;;  %vm408_vm0 = vcmask 1044480   ;;  %vm409_vm1 = vcmask 1045504   ;;  %v807_v6 = vmov 65535   ;;  %v744_v8 = vld [vmem:[%s971_s1] sm:$0xff]  }
  0x2e   : > { %v410_v7 = vsel %vm408_vm0, 4294967295, %v807_v6  ;;  %vm401_vm2 = vcmask 220160   ;;  %v743_v11 = vld [vmem:[%s290_s16] sm:$0xff]   ;;  %v808_v13 = vmov 0   ;;  %v359_v15 = vld [vmem:[%s972_s2 + $0x18] sm:$0xff]  ;;  %v357_v16 = vld [vmem:[%s972_s2 + $0x8] sm:$0xff] }
  0x2f   : > { %v411_v9 = vsel %vm409_vm1, %v410_v7, 0  ;;  %667 = vmatprep.mubr.msk.bf16.mxu0 %vm401_vm2, %v744_v8  ;;  %v358_v12 = vld [vmem:[%s972_s2 + $0x10] sm:$0xff]  ;;  %740 = vset.pattern.permute.xlu0 %v808_v13  ;;  %v356_v14 = vld [vmem:[%s972_s2] sm:$0xff]  ;;  %v745_v17 = vld [vmem:[%s971_s1 + $0x8] sm:$0xff]   ;;  %v809_v18 = vmov 0.0   ;;  %vm810_vm3 = vmmov 0  }
  0x30   : > { %v413_v10 = vand.u32 %v742_v5, %v411_v9  ;;  %741 = vset.pattern.permute.xlu1 %v808_v13  ;;  %372 = vperm.xlu0 %740, %v358_v12   ;;  %v468_v37 = vld [vmem:[%s911_s8] sm:$0x3]  ;;  %vm471_vm4 = vcmask 261120  }
  0x31   : > { %362 = vperm.xlu1 %741, %v356_v14   ;;  %671 = vmatprep.subr.bf16.mxu1 %v809_v18  ;;  %v515_v47 = vld [vmem:[%s921_s15] sm:$0x3] }
  0x32   : > { %663 = vmatprep.subr.bf16.mxu0 %v413_v10  ;;  %675 = vmatprep.mubr.msk.bf16.mxu1 %vm810_vm3, %v809_v18  ;;  %v516_v48 = vunpack.c.l.bf16 %v515_v47 }
  0x33   : > { %664 = vmatpush3.bf16.msra.mxu0 %v413_v10  ;;  %v528_v54 = vld [vmem:[%s916_s13] sm:$0x7] }
  0x34   : > { %665 = vmatprep.subr.bf16.mxu0 %v743_v11  ;;  %377 = vperm.xlu0 %740, %v359_v15  }
  0x35   : > { %367 = vperm.xlu1 %741, %v357_v16  }
  0x37   : > { %666 = vmatpush3.bf16.msra.mxu0 %v743_v11 }
  0x3a   : > { %668 = vmatmul.mubr.msk.bf16.vlgmr.msra.gmra.mxu0 %vm401_vm2, %v745_v17 }
  0xab   : > { %v373_v19 = vpop.permute.xlu0 %372 }
  0xac   : > { %v363_v20 = vpop.permute.xlu1 %362 }
  0xaf   : > { %v378_v24 = vpop.permute.xlu0 %377 }
  0xb0   : > { %v368_v27 = vpop.permute.xlu1 %367 }
  0xfa   : > { %v669_v21 = vpop.f32.mrf.mxu0 }
  0xfb   : > { %v458_v23 = vadd.f32 %v669_v21, %v373_v19 }
  0xfc   : > { %v449_v22 = vpop.f32.mrf.mxu0 }
  0xfd   : > { %v466_v29 = vmax.f32 %v458_v23, 0.0  ;;  %v450_v30 = vadd.f32 %v449_v22, %v363_v20 }
  0xfe   : > { %v670_v25 = vpop.f32.mrf.mxu0 }
  0xff   : > { %v461_v26 = vadd.f32 %v670_v25, %v378_v24  ;;  %v464_v35 = vmax.f32 %v450_v30, 0.0 }
 0x100   : > { %v452_v28 = vpop.f32.mrf.mxu0 }
 0x101   : > { %v467_v31 = vmax.f32 %v461_v26, 0.0  ;;  %v453_v32 = vadd.f32 %v452_v28, %v368_v27 }
 0x103   : > { %v465_v33 = vmax.f32 %v453_v32, 0.0  ;;  %v470_v34 = vpack.c.bf16 %v467_v31, %v466_v29 }
 0x105   : > { %672 = vmatpush3.bf16.msra.mxu1 %v470_v34  ;;  %v469_v36 = vpack.c.bf16 %v465_v33, %v464_v35 }
 0x106   : > { %673 = vmatprep.subr.bf16.mxu1 %v809_v18 }
 0x109   : > { %674 = vmatpush3.bf16.msra.mxu1 %v469_v36 }
 0x10c   : > { %676 = vmatmul.mubr.msk.bf16.vlgmr.msra.gmra.mxu1 %vm471_vm4, %v468_v37 }
 0x1cc   : > { %v509_v38 = vpop.f32.mrf.mxu1 }
 0x1cd   : > { %v520_v39 = vand.u32 2147483647, %v509_v38  ;;  %v517_v49 = vmax.f32 %v509_v38, 0.0  ;;  %v518_v50 = vmul.f32 %v516_v48, %v509_v38 }
 0x1ce   : > { %v677_v40 = vpop.f32.mrf.mxu1 }
 0x1cf   : > { %v521_v41 = vsub.f32 0.0, %v520_v39  ;;  %v519_v52 = vsub.f32 %v517_v49, %v518_v50 }
 0x1d0   : > { %v512_v42 = vpop.f32.mrf.mxu1 }
 0x1d1   : > { %v522_v43 = vmul.f32 1.442695, %v521_v41 }
 0x1d2   : > { %v678_v44 = vpop.f32.mrf.mxu1 }
 0x1d3   : > { %746 = vpow2.f32 %v522_v43 }
 0x1e0   : > { %v747_v45 = vpop.eup %746 }
 0x1e1   : > { %v524_v46 = vadd.f32 1.0, %v747_v45 }
 0x1e3   : > { %748 = vlog2.f32 %v524_v46 }
 0x1f0   : > { %v749_v51 = vpop.eup %748 }
 0x1f1   : > { %v526_v53 = vmul.f32 0.6931472, %v749_v51 }
 0x1f3   : > { %v527_v55 = vadd.f32 %v526_v53, %v519_v52 }
 0x1f5   : > { %v529_v56 = vadd.f32 %v528_v54, %v527_v55 }
 0x1f7   : > { %530 = vst [vmem:[%s916_s13] sm:$0x7] %v529_v56 }
 0x1f8 PF: > { %s15_s24 = sadd.s32 1, %s804_s24   ;;  %s976_s18 = smov %s784_s19 }
 0x1f9   : > { %p12_p13 = scmp.ge.s32.totalorder %s15_s24, 6   ;;  %s977_s19 = smov %s892_s6 }
 0x1fa   : > { %s978_s20 = smov %s796_s22  ;;  %s979_s21 = smov %s800_s23 }
 0x1fb   : > { %s980_s22 = smov %s983_s25  ;;  %s981_s23 = smov %s987_s26 }
 0x1fc   :  { %14 = sbr.rel (!%p12_p13) target bundleno = 4 (0x4), region = 126 }

</bundles_post_ra>
